<compile_context>
chip_gen: v6e
topology: v6e:2x2x1
jax: 0.10.0
libtpu: 0.0.40
codegen_flags: <defaults>
</compile_context>

<pallas_src>
import jax
import jax.numpy as jnp
from jax.experimental import pallas as pl
from jax.experimental.pallas import tpu as pltpu


def _dynamic_tanh_kernel(alpha_ref, gamma_ref, beta_ref, x_ref, o_ref):
    a = alpha_ref[0]                           # scalar alpha (SMEM, f32)
    x = x_ref[...].astype(jnp.float32)         # (ROWS, LANE_BLOCK)
    g = gamma_ref[...]                         # (ROWS, 1) f32 per-row scale
    b = beta_ref[...]                          # (ROWS, 1) f32 per-row shift
    y = jnp.tanh(a * x) * g + b                # lane-broadcast on the VPU/EUP
    o_ref[...] = y.astype(o_ref.dtype)


def _tpu_vmem_capacity_bytes():
    """Per-TensorCore VMEM; conservative fallback is the v7x value (64 MiB)."""
    try:
        return int(pltpu.get_tpu_info().vmem_capacity_bytes)
    except Exception:
        return 64 * 1024 * 1024


def _choose_tiles(rows, lanes, itemsize, budget_bytes, target_block_bytes):
    """Pick (rows_per_block, lane_block) so the whole double-buffered set
    (in + out + lane-padded gamma/beta) stays under budget_bytes."""
    sub = max(8, 32 // itemsize)               # sublane pack: f32=8, bf16=16, i8=32
    gb_row_bytes = 2 * 2 * 128 * 4             # gamma+beta, 2 bufs each, padded to 128 lanes, f32

    # Only tile the lane axis when even a minimal (sub-row, full-lane) block
    # would overflow the budget (huge H*W); lane tiles are multiples of 128.
    lane_block = lanes
    if sub * (4 * lanes * itemsize + gb_row_bytes) > budget_bytes:
        lane_block = budget_bytes // (4 * sub * itemsize)
        lane_block = max(128, (lane_block // 128) * 128)
        lane_block = min(lane_block, max(128, (lanes // 128) * 128))

    per_row_bytes = 4 * lane_block * itemsize + gb_row_bytes   # 2x in + 2x out + g/b
    r_budget = max(sub, budget_bytes // per_row_bytes)
    r_target = max(sub, target_block_bytes // max(1, lane_block * itemsize))
    rows_per_block = max(sub, (min(r_budget, r_target) // sub) * sub)
    if rows <= rows_per_block:
        rows_per_block = rows                  # full-dim block is always legal
    return rows_per_block, lane_block


def dynamic_tanh(x, alpha, gamma, beta, *, target_block_bytes=4 * 1024 * 1024):
    """x: (N, C, H, W); alpha: (1,); gamma, beta: (C,). Returns (N, C, H, W)."""
    N, C, H, W = x.shape
    assert gamma.shape == (C,) and beta.shape == (C,) and alpha.shape == (1,)

    dtype = x.dtype
    itemsize = jnp.dtype(dtype).itemsize
    rows = N * C
    lanes = H * W

    # Free (contiguous) reshape to a 2-D (rows, lanes) view; no padding, so no
    # extra HBM passes and no post-kernel slice copy.
    x2 = x.reshape(rows, lanes)

    # Per-row gamma/beta columns: row n*C + c -> channel c (tiny arrays).
    gamma_rows = jnp.tile(gamma.astype(jnp.float32), N).reshape(rows, 1)
    beta_rows = jnp.tile(beta.astype(jnp.float32), N).reshape(rows, 1)

    phys_vmem = _tpu_vmem_capacity_bytes()
    budget = min(28 * 1024 * 1024, phys_vmem // 2)
    rows_per_block, lane_block = _choose_tiles(
        rows, lanes, itemsize, budget, target_block_bytes)

    grid = (pl.cdiv(rows, rows_per_block), pl.cdiv(lanes, lane_block))

    # Real buffer set: 2x x-block + 2x out-block + 2x (gamma + beta) padded cols.
    total_block_bytes = (4 * rows_per_block * lane_block * itemsize
                         + 4 * rows_per_block * 128 * 4)
    vmem_limit = int(min(phys_vmem * 3 // 4, total_block_bytes + (16 << 20)))

    out2 = pl.pallas_call(
        _dynamic_tanh_kernel,
        out_shape=jax.ShapeDtypeStruct((rows, lanes), dtype),
        grid=grid,
        in_specs=[
            pl.BlockSpec(memory_space=pltpu.MemorySpace.SMEM),               # alpha
            pl.BlockSpec((rows_per_block, 1), lambda i, j: (i, 0)),          # gamma rows
            pl.BlockSpec((rows_per_block, 1), lambda i, j: (i, 0)),          # beta rows
            pl.BlockSpec((rows_per_block, lane_block), lambda i, j: (i, j)),  # x
        ],
        out_specs=pl.BlockSpec((rows_per_block, lane_block), lambda i, j: (i, j)),
        compiler_params=pltpu.CompilerParams(
            dimension_semantics=("parallel", "parallel"),
            vmem_limit_bytes=vmem_limit,
        ),
        cost_estimate=pl.CostEstimate(
            flops=4 * rows * lanes,
            transcendentals=rows * lanes,
            bytes_accessed=2 * rows * lanes * itemsize + 2 * rows * 4 + 4,
        ),
    )(alpha.astype(jnp.float32).reshape(1), gamma_rows, beta_rows, x2)

    return out2.reshape(N, C, H, W)


def dynamic_tanh_ref(x, alpha, gamma, beta):
    """Pure-JAX reference, mirroring the PyTorch forward exactly."""
    y = jnp.tanh(alpha[0] * x)
    return gamma.reshape(1, -1, 1, 1) * y + beta.reshape(1, -1, 1, 1)


if __name__ == "__main__":
    key = jax.random.PRNGKey(0)
    init_alpha = 1.0

    # ---- Case 1: nicely aligned small shape -------------------------------
    N, C, H, W = 2, 4, 16, 16
    x = jax.random.normal(key, (N, C, H, W), dtype=jnp.float32)

    # Parameter init matching nn.Module.__init__ (then perturbed, deterministic).
    alpha = jnp.ones((1,), dtype=jnp.float32) * init_alpha
    gamma = jnp.ones((C,), dtype=jnp.float32) + 0.1 * jnp.arange(C, dtype=jnp.float32)
    beta = jnp.zeros((C,), dtype=jnp.float32) - 0.05 * jnp.arange(C, dtype=jnp.float32)

    out = jax.block_until_ready(dynamic_tanh(x, alpha, gamma, beta))
    ref = dynamic_tanh_ref(x, alpha, gamma, beta)
    assert out.shape == (N, C, H, W)
    assert jnp.allclose(out, ref, atol=1e-6, rtol=1e-6), "mismatch vs reference (aligned)"

    # ---- Case 2: ragged shape (H*W % 128 != 0, rows % 8 != 0) -------------
    # Exercises the no-padding path: masked edge blocks instead of jnp.pad.
    N2, C2, H2, W2 = 2, 5, 7, 9
    key2 = jax.random.PRNGKey(0)
    x2 = jax.random.normal(key2, (N2, C2, H2, W2), dtype=jnp.float32)
    gamma2 = jnp.ones((C2,), dtype=jnp.float32) + 0.1 * jnp.arange(C2, dtype=jnp.float32)
    beta2 = jnp.zeros((C2,), dtype=jnp.float32) - 0.05 * jnp.arange(C2, dtype=jnp.float32)

    out2 = jax.block_until_ready(dynamic_tanh(x2, alpha, gamma2, beta2))
    ref2 = dynamic_tanh_ref(x2, alpha, gamma2, beta2)
    assert out2.shape == (N2, C2, H2, W2)
    assert jnp.allclose(out2, ref2, atol=1e-6, rtol=1e-6), "mismatch vs reference (ragged)"

    print("KERNEL_OK")
</pallas_src>

<mosaic_0001>
module attributes {stable_mosaic.version = 11 : i64} {
  func.func @_dynamic_tanh_kernel(%arg0: i32, %arg1: i32, %arg2: memref<1xf32, #tpu.memory_space<smem>>, %arg3: memref<8x1xf32, #tpu.memory_space<vmem>>, %arg4: memref<8x1xf32, #tpu.memory_space<vmem>>, %arg5: memref<8x256xf32, #tpu.memory_space<vmem>>, %arg6: memref<8x256xf32, #tpu.memory_space<vmem>>) attributes {dimension_semantics = [#tpu.dimension_semantics<parallel>, #tpu.dimension_semantics<parallel>], iteration_bounds = array<i64: 1, 1>, scalar_prefetch = 0 : i64, scratch_operands = 0 : i64, tpu.core_type = #tpu.core_type<tc>, window_params = [{transform_indices = @transform_0, window_bounds = array<i64: 1>}, {transform_indices = @transform_1, window_bounds = array<i64: 8, 1>}, {transform_indices = @transform_2, window_bounds = array<i64: 8, 1>}, {transform_indices = @transform_3, window_bounds = array<i64: 8, 256>}, {transform_indices = @transform_4, window_bounds = array<i64: 8, 256>}]} {
    %c0 = arith.constant 0 : index
    %0 = memref.load %arg2[%c0] : memref<1xf32, #tpu.memory_space<smem>>
    %c0_0 = arith.constant 0 : index
    %c0_1 = arith.constant 0 : index
    %1 = vector.load %arg5[%c0_0, %c0_1] : memref<8x256xf32, #tpu.memory_space<vmem>>, vector<8x256xf32>
    %c0_2 = arith.constant 0 : index
    %c0_3 = arith.constant 0 : index
    %2 = vector.load %arg3[%c0_2, %c0_3] : memref<8x1xf32, #tpu.memory_space<vmem>>, vector<8x1xf32>
    %c0_4 = arith.constant 0 : index
    %c0_5 = arith.constant 0 : index
    %3 = vector.load %arg4[%c0_4, %c0_5] : memref<8x1xf32, #tpu.memory_space<vmem>>, vector<8x1xf32>
    %4 = vector.broadcast %0 : f32 to vector<8x256xf32>
    %5 = arith.mulf %4, %1 : vector<8x256xf32>
    %6 = math.tanh %5 : vector<8x256xf32>
    %7 = vector.broadcast %2 : vector<8x1xf32> to vector<8x256xf32>
    %8 = arith.mulf %6, %7 : vector<8x256xf32>
    %9 = vector.broadcast %3 : vector<8x1xf32> to vector<8x256xf32>
    %10 = arith.addf %8, %9 : vector<8x256xf32>
    %c0_6 = arith.constant 0 : index
    %c0_7 = arith.constant 0 : index
    %11 = vector.load %arg6[%c0_6, %c0_7] : memref<8x256xf32, #tpu.memory_space<vmem>>, vector<8x256xf32>
    tpu.vector_store %arg6[%c0_6, %c0_7], %10 {strides = array<i32>} : memref<8x256xf32, #tpu.memory_space<vmem>>, vector<8x256xf32>,
    return
  }
  func.func @transform_0(%arg0: i32, %arg1: i32) -> i32 {
    %c0_i32 = arith.constant 0 : i32
    %c0_i32_0 = arith.constant 0 : i32
    return %c0_i32 : i32
  }
  func.func @transform_1(%arg0: i32, %arg1: i32) -> (i32, i32) {
    %c0_i32 = arith.constant 0 : i32
    %c0_i32_0 = arith.constant 0 : i32
    return %arg0, %c0_i32 : i32, i32
  }
  func.func @transform_2(%arg0: i32, %arg1: i32) -> (i32, i32) {
    %c0_i32 = arith.constant 0 : i32
    %c0_i32_0 = arith.constant 0 : i32
    return %arg0, %c0_i32 : i32, i32
  }
  func.func @transform_3(%arg0: i32, %arg1: i32) -> (i32, i32) {
    %c0_i32 = arith.constant 0 : i32
    return %arg0, %arg1 : i32, i32
  }
  func.func @transform_4(%arg0: i32, %arg1: i32) -> (i32, i32) {
    %c0_i32 = arith.constant 0 : i32
    return %arg0, %arg1 : i32, i32
  }
}

</mosaic_0001>

<bundles_post_ra>
// kernel: tpu_custom_call.1
= control target key start
LH: loop header
LB: loop body
LE: loop exit
PB: predicated region body
PF: predicated region fallthrough
CT: control target
= control target key end

     0   :  { %v88_v1 = vmov 0   ;;  %s133_s0 = inlined_call_operand.<no memory space> [shape: f32[1], index: 0, kind: input, shape index: {}]   ;;  %s134_s1 = inlined_call_operand.vmem [shape: f32[8,1], index: 1, kind: input, shape index: {}]   ;;  %s135_s2 = inlined_call_operand.vmem [shape: f32[8,1], index: 2, kind: input, shape index: {}]   ;;  %s136_s3 = inlined_call_operand.vmem [shape: f32[8,256], index: 3, kind: input, shape index: {}]   ;;  %s137_s4 = inlined_call_operand.hbm [shape: f32[8,256], index: 4, kind: output, shape index: {}]  }
   0x1   :  { %v22_v0 = vld [vmem:[%s134_s1] sm:$0xff]  ;;  %61 = vset.pattern.permute.xlu0 %v88_v1 }
   0x2   :  { %10 = vsyncpa [#allocation4], 0  ;;  %31 = vperm.xlu0 %61, %v22_v0   ;;  %v23_v2 = vld [vmem:[%s135_s2] sm:$0xff]  ;;  %v24_v3 = vstv %s133_s0  ;;  %v21_v5 = vld [vmem:[%s136_s3 + $0x8] sm:$0xff]  ;;  %s89_s1 = smov [#allocation3]  }
   0x3   :  { %v20_v4 = vld [vmem:[%s136_s3] sm:$0xff]  ;;  %v26_v7 = vmul.f32 %v24_v3, %v21_v5  ;;  %s51_s2 = sshll.u32 %s89_s1, 4  ;;  %s52_s2 = int_to_ptr.vmem [resolvable:$true] %s51_s2 }
   0x4   :  { %v25_v6 = vmul.f32 %v24_v3, %v20_v4  ;;  %s66_s0 = scalar_lea.vmem %s52_s2, 256  ;;  %p71_p1 = scmp.lt.s32.totalorder %s52_s2, %s52_s2 }
   0x5   :  { %p67_p0 = scmp.ne.s32.totalorder %s52_s2, %s66_s0  ;;  %p72_p2 = scmp.lt.s32.totalorder %s66_s0, %s66_s0 }
   0x6   :  { %38 = vperm.xlu0 %61, %v23_v2   ;;  %62 = vtanh.f32 %v25_v6 }
   0x7   :  { %64 = vtanh.f32 %v26_v7  ;;  %p73_p3 = por %p72_p2, %p71_p1 }
   0x9   :  { %p74_p4 = pnand %p73_p3, %p67_p0 }
  0x13   :  { %v63_v8 = vpop.eup %62 }
  0x14   :  { %v65_v9 = vpop.eup %64 }
  0x7d   :  { %v32_v10 = vpop.permute.xlu0 %31 }
  0x7e   :  { %v34_v11 = vmul.f32 %v63_v8, %v32_v10  ;;  %v35_v12 = vmul.f32 %v65_v9, %v32_v10 }
  0x81   :  { %v39_v13 = vpop.permute.xlu0 %38 }
  0x82   :  { %v41_v14 = vadd.f32 %v39_v13, %v34_v11  ;;  %v42_v15 = vadd.f32 %v39_v13, %v35_v12 }
  0x84   :  { %43 = vst [vmem:[#allocation3] sm:$0xff] %v41_v14  ;;  %44 = vst [vmem:[#allocation3 + $0x8] sm:$0xff] %v42_v15 }
  0x85   :  { %77 = shalt.err (!%p74_p4)
}
  0x86   :  { %54 = dma.vmem_to_hbm [thread:$0]  %s52_s2, 256, %s137_s4, [#allocation4]  }
  0x87   :  { %86 = dma.done.wait [#allocation4], 256  }
  0x88   :  { %87 = vsyncadd [#allocation4], 4294967040 }
  0x89   :  { %58 = vsyncpa [#allocation4], 1 }

</bundles_post_ra>
